<compile_context>
chip_gen: v6e
topology: v6e:2x2x1
jax: 0.10.0
libtpu: 0.0.40
codegen_flags: <defaults>
</compile_context>

<pallas_src>
import functools
import math

import jax
import jax.numpy as jnp
from jax import lax
from jax.experimental import pallas as pl
from jax.experimental.pallas import tpu as pltpu


def _instance_loss_kernel(q_ref, k_ref, o_ref, m_ref, l_ref, pos_ref, *,
                          tq, tk, batch):
    """One (row-tile, column-tile) grid step of the online-logsumexp loss."""
    qi = pl.program_id(0)  # row-tile index (parallel)
    ki = pl.program_id(1)  # column-tile index (reduction, innermost)

    @pl.when(ki == 0)
    def _init():
        m_ref[...] = jnp.full_like(m_ref, -jnp.inf)
        l_ref[...] = jnp.zeros_like(l_ref)
        pos_ref[...] = jnp.zeros_like(pos_ref)

    # bf16 x bf16 -> f32 on the MXU, contracting the last dim of both operands
    # (no transpose of the K tile is materialized).
    s = lax.dot_general(q_ref[...], k_ref[...], (((1,), (1,)), ((), ())),
                        preferred_element_type=jnp.float32)

    row0 = qi * tq  # first global row of this tile
    col0 = ki * tk  # first global column of this tile

    # ---------- positive logit: sim[i, (i+B) mod N], read out of s ----------
    # tq divides B, so a row tile is entirely in the first or second half and
    # the partner-column offset is uniformly +B or -B for the whole tile.
    part_off = jnp.where(row0 < batch, batch, -batch)
    p_start = row0 + part_off  # first partner column; range [p_start, p_start+tq)

    pos_overlap = jnp.logical_and(col0 < p_start + tq, p_start < col0 + tk)

    @pl.when(pos_overlap)
    def _extract_pos():
        r = row0 + lax.broadcasted_iota(jnp.int32, s.shape, 0)
        c = col0 + lax.broadcasted_iota(jnp.int32, s.shape, 1)
        is_pos = c == r + part_off  # exactly one true column per row, globally
        pos_ref[...] += jnp.sum(jnp.where(is_pos, s, 0.0),
                                axis=-1, keepdims=True)

    # ---------- streaming logsumexp over j != i ----------
    def _online_update(s_blk):
        m_prev = m_ref[...]
        m_new = jnp.maximum(m_prev, jnp.max(s_blk, axis=-1, keepdims=True))
        alpha = jnp.exp(m_prev - m_new)
        l_ref[...] = alpha * l_ref[...] + jnp.sum(jnp.exp(s_blk - m_new),
                                                  axis=-1, keepdims=True)
        m_ref[...] = m_new

    # Only ~gq of the gq*gk grid steps touch the global diagonal; the others
    # run a mask-free update (review item 7).
    diag_overlap = jnp.logical_and(col0 < row0 + tq, row0 < col0 + tk)

    @pl.when(diag_overlap)
    def _update_masked():
        r = row0 + lax.broadcasted_iota(jnp.int32, s.shape, 0)
        c = col0 + lax.broadcasted_iota(jnp.int32, s.shape, 1)
        _online_update(jnp.where(r == c, -jnp.inf, s))

    @pl.when(jnp.logical_not(diag_overlap))
    def _update_unmasked():
        _online_update(s)

    @pl.when(ki == pl.num_programs(1) - 1)
    def _finalize():
        o_ref[...] = m_ref[...] + jnp.log(l_ref[...]) - pos_ref[...]


def _vmem_plan():
    """Generation-aware VMEM budget (review item 4)."""
    cap = None
    try:
        cap = int(getattr(pltpu.get_tpu_info(), "vmem_capacity_bytes", 0)) or None
    except Exception:
        cap = None
    if cap is None:
        cap = 64 * 1024 * 1024  # conservative fallback: v7x per-TensorCore VMEM
    # Leave headroom for compiler-internal scratch/spills; never ask for more
    # than ~100 MiB even on 128 MiB parts.
    vmem_limit = min(int(cap * 0.8), 100 * 1024 * 1024)
    tile_budget = int(vmem_limit * 0.85)  # our per-tile accounting is approximate
    return tile_budget, vmem_limit


def _tile_bytes(tq, tk, dp):
    """Rough live-VMEM estimate for one grid step."""
    qk = 2 * (tq + tk) * dp * 2      # double-buffered bf16 Q and K tiles
    s = 8 * tq * tk * 4              # s tile + exp/mask temporaries (conservative)
    scratch = 5 * tq * 128 * 4       # (tq,1) f32 scratches + output, lane-padded
    return qk + s + scratch


def _pick_tiles(b, n, dp, budget):
    """Pick (tq, tk).  Bigger tq first: total K HBM traffic ~ (N/tq)*N*D bytes."""
    cands = (1024, 512, 256, 128, 64, 32, 16, 8)
    tq_cands = [t for t in cands if b % t == 0]
    tk_cands = [t for t in cands if n % t == 0]
    if not tq_cands or not tk_cands:
        raise ValueError("batch_size must be a multiple of 8 for the tiled kernel")
    for tq in tq_cands:                 # note: tq | B  =>  gq = 2B/tq is even,
        for tk in tk_cands:             # so both v7x TensorCores always get work.
            if _tile_bytes(tq, tk, dp) <= budget:
                return tq, tk
    return tq_cands[-1], tk_cands[-1]


def instance_loss(z_i, z_j, *, temperature):
    """Pallas implementation of InstanceLoss.forward(z_i, z_j)."""
    assert z_i.shape == z_j.shape and z_i.ndim == 2
    b, d = z_i.shape
    n = 2 * b

    # Wrapper glue (fuses under XLA): concat, fold 1/sqrt(T) in f32, zero-pad D
    # to a multiple of 128, then cast to bf16 for native-rate MXU feeds.
    z = jnp.concatenate([z_i, z_j], axis=0).astype(jnp.float32)
    z = z * jnp.float32(1.0 / math.sqrt(float(temperature)))
    dp = ((d + 127) // 128) * 128
    if dp != d:
        z = jnp.pad(z, ((0, 0), (0, dp - d)))
    z = z.astype(jnp.bfloat16)

    tile_budget, vmem_limit = _vmem_plan()
    tq, tk = _pick_tiles(b, n, dp, tile_budget)
    gq, gk = n // tq, n // tk

    kernel = functools.partial(_instance_loss_kernel, tq=tq, tk=tk, batch=b)

    per_row = pl.pallas_call(
        kernel,
        out_shape=jax.ShapeDtypeStruct((n, 1), jnp.float32),
        grid_spec=pltpu.PrefetchScalarGridSpec(
            num_scalar_prefetch=0,
            grid=(gq, gk),
            in_specs=[
                # Q row tile: resident across the column (reduction) axis.
                pl.BlockSpec((tq, dp), lambda qi, ki: (qi, 0)),
                # K column tile: streamed (double-buffered) along ki.
                # If profiling shows exposed K DMA, add pipeline_mode=pl.Buffered(3).
                pl.BlockSpec((tk, dp), lambda qi, ki: (ki, 0)),
            ],
            out_specs=pl.BlockSpec((tq, 1), lambda qi, ki: (qi, 0)),
            scratch_shapes=[
                pltpu.VMEM((tq, 1), jnp.float32),  # running max  m_i
                pltpu.VMEM((tq, 1), jnp.float32),  # running sum  l_i
                pltpu.VMEM((tq, 1), jnp.float32),  # positive logit pos_i
            ],
        ),
        compiler_params=pltpu.CompilerParams(
            dimension_semantics=("parallel", "arbitrary"),
            vmem_limit_bytes=vmem_limit,
        ),
    )(z, z)

    # Tiny O(N) reduce + normalization left to XLA.
    return jnp.sum(per_row) / jnp.float32(n)


def _reference_loss(z_i, z_j, temperature):
    """Pure-JAX f32 reference mirroring the PyTorch module."""
    b = z_i.shape[0]
    n = 2 * b
    z = jnp.concatenate([z_i, z_j], axis=0).astype(jnp.float32)
    sim = (z @ z.T) / temperature
    idx = jnp.arange(n)
    pos = sim[idx, (idx + b) % n]
    sim_masked = jnp.where(jnp.eye(n, dtype=bool), -jnp.inf, sim)
    lse = jax.scipy.special.logsumexp(sim_masked, axis=-1)
    return jnp.sum(lse - pos) / n


if __name__ == "__main__":
    batch_size = 8
    hidden = 32
    temperature = 0.5

    key = jax.random.PRNGKey(0)
    k1, k2 = jax.random.split(key)
    z_i = jax.random.normal(k1, (batch_size, hidden), dtype=jnp.float32)
    z_j = jax.random.normal(k2, (batch_size, hidden), dtype=jnp.float32)

    loss = instance_loss(z_i, z_j, temperature=temperature)
    loss = jax.block_until_ready(loss)

    ref = _reference_loss(z_i, z_j, temperature)
    # bf16 MXU inputs (f32 accumulation): tolerance loosened per the perf review.
    assert jnp.allclose(loss, ref, rtol=3e-2, atol=3e-2), (loss, ref)

    print("KERNEL_OK")
</pallas_src>

<mosaic_0001>
module attributes {stable_mosaic.version = 11 : i64} {
  func.func @_instance_loss_kernel(%arg0: i32, %arg1: i32, %arg2: memref<8x128xbf16, #tpu.memory_space<vmem>>, %arg3: memref<16x128xbf16, #tpu.memory_space<vmem>>, %arg4: memref<8x1xf32, #tpu.memory_space<vmem>>, %arg5: memref<8x1xf32, #tpu.memory_space<vmem>>, %arg6: memref<8x1xf32, #tpu.memory_space<vmem>>, %arg7: memref<8x1xf32, #tpu.memory_space<vmem>>) attributes {dimension_semantics = [#tpu.dimension_semantics<parallel>, #tpu.dimension_semantics<arbitrary>], iteration_bounds = array<i64: 2, 1>, scalar_prefetch = 0 : i64, scratch_operands = 3 : i64, tpu.core_type = #tpu.core_type<tc>, window_params = [{transform_indices = @transform_0, window_bounds = array<i64: 8, 128>}, {transform_indices = @transform_1, window_bounds = array<i64: 16, 128>}, {transform_indices = @transform_2, window_bounds = array<i64: 8, 1>}]} {
    %c0_i32 = arith.constant 0 : i32
    %0 = arith.cmpi eq, %arg1, %c0_i32 : i32
    %1 = arith.extui %0 : i1 to i32
    %c0_i32_0 = arith.constant 0 : i32
    %2 = arith.cmpi ne, %1, %c0_i32_0 : i32
    scf.if %2 {
      %cst_15 = arith.constant 0xFF800000 : f32
      %31 = vector.broadcast %cst_15 : f32 to vector<8x1xf32>
      %c0_16 = arith.constant 0 : index
      %c0_17 = arith.constant 0 : index
      %32 = vector.load %arg5[%c0_16, %c0_17] : memref<8x1xf32, #tpu.memory_space<vmem>>, vector<8x1xf32>
      tpu.vector_store %arg5[%c0_16, %c0_17], %31 {strides = array<i32>} : memref<8x1xf32, #tpu.memory_space<vmem>>, vector<8x1xf32>,
      %cst_18 = arith.constant 0.000000e+00 : f32
      %33 = vector.broadcast %cst_18 : f32 to vector<8x1xf32>
      %c0_19 = arith.constant 0 : index
      %c0_20 = arith.constant 0 : index
      %34 = vector.load %arg6[%c0_19, %c0_20] : memref<8x1xf32, #tpu.memory_space<vmem>>, vector<8x1xf32>
      tpu.vector_store %arg6[%c0_19, %c0_20], %33 {strides = array<i32>} : memref<8x1xf32, #tpu.memory_space<vmem>>, vector<8x1xf32>,
      %cst_21 = arith.constant 0.000000e+00 : f32
      %35 = vector.broadcast %cst_21 : f32 to vector<8x1xf32>
      %c0_22 = arith.constant 0 : index
      %c0_23 = arith.constant 0 : index
      %36 = vector.load %arg7[%c0_22, %c0_23] : memref<8x1xf32, #tpu.memory_space<vmem>>, vector<8x1xf32>
      tpu.vector_store %arg7[%c0_22, %c0_23], %35 {strides = array<i32>} : memref<8x1xf32, #tpu.memory_space<vmem>>, vector<8x1xf32>,
    } else {
    }
    %c0 = arith.constant 0 : index
    %c0_1 = arith.constant 0 : index
    %3 = vector.load %arg2[%c0, %c0_1] : memref<8x128xbf16, #tpu.memory_space<vmem>>, vector<8x128xbf16>
    %c0_2 = arith.constant 0 : index
    %c0_3 = arith.constant 0 : index
    %4 = vector.load %arg3[%c0_2, %c0_3] : memref<16x128xbf16, #tpu.memory_space<vmem>>, vector<16x128xbf16>
    %cst = arith.constant dense<0.000000e+00> : vector<8x16xf32>
    %5 = tpu.matmul %3, %4, %cst {dimension_numbers = #tpu.dot_dimension_numbers<[1], [1], [0], [0], [0, 0, 1, 0], [], []>} : vector<8x128xbf16>, vector<16x128xbf16>, vector<8x16xf32> -> vector<8x16xf32>
    %c8_i32 = arith.constant 8 : i32
    %6 = arith.muli %arg0, %c8_i32 : i32
    %c16_i32 = arith.constant 16 : i32
    %7 = arith.muli %arg1, %c16_i32 : i32
    %c8_i32_4 = arith.constant 8 : i32
    %8 = arith.cmpi slt, %6, %c8_i32_4 : i32
    %c8_i32_5 = arith.constant 8 : i32
    %c-8_i32 = arith.constant -8 : i32
    %9 = arith.select %8, %c8_i32_5, %c-8_i32 : i32
    %10 = arith.addi %6, %9 : i32
    %c8_i32_6 = arith.constant 8 : i32
    %11 = arith.addi %10, %c8_i32_6 : i32
    %12 = arith.cmpi slt, %7, %11 : i32
    %c16_i32_7 = arith.constant 16 : i32
    %13 = arith.addi %7, %c16_i32_7 : i32
    %14 = arith.cmpi slt, %10, %13 : i32
    %15 = arith.andi %12, %14 : i1
    %16 = arith.extui %15 : i1 to i32
    %c0_i32_8 = arith.constant 0 : i32
    %17 = arith.cmpi ne, %16, %c0_i32_8 : i32
    scf.if %17 {
      %31 = tpu.iota {dimensions = array<i32: 0>} : vector<8x16xi32>
      %32 = vector.broadcast %6 : i32 to vector<8x16xi32>
      %33 = arith.addi %32, %31 : vector<8x16xi32>
      %34 = tpu.iota {dimensions = array<i32: 1>} : vector<8x16xi32>
      %35 = vector.broadcast %7 : i32 to vector<8x16xi32>
      %36 = arith.addi %35, %34 : vector<8x16xi32>
      %37 = vector.broadcast %9 : i32 to vector<8x16xi32>
      %38 = arith.addi %33, %37 : vector<8x16xi32>
      %39 = arith.cmpi eq, %36, %38 : vector<8x16xi32>
      %c0_15 = arith.constant 0 : index
      %c0_16 = arith.constant 0 : index
      %40 = vector.load %arg7[%c0_15, %c0_16] : memref<8x1xf32, #tpu.memory_space<vmem>>, vector<8x1xf32>
      %cst_17 = arith.constant 0.000000e+00 : f32
      %41 = vector.broadcast %cst_17 : f32 to vector<8x16xf32>
      %42 = arith.select %39, %5, %41 : vector<8x16xi1>, vector<8x16xf32>
      %cst_18 = arith.constant dense<0.000000e+00> : vector<8xf32>
      %43 = vector.multi_reduction <add>, %42, %cst_18 [1] : vector<8x16xf32> to vector<8xf32>
      %44 = vector.shape_cast %43 : vector<8xf32> to vector<8x1xf32>
      %45 = arith.addf %40, %44 : vector<8x1xf32>
      %c0_19 = arith.constant 0 : index
      %c0_20 = arith.constant 0 : index
      %46 = vector.load %arg7[%c0_19, %c0_20] : memref<8x1xf32, #tpu.memory_space<vmem>>, vector<8x1xf32>
      tpu.vector_store %arg7[%c0_19, %c0_20], %45 {strides = array<i32>} : memref<8x1xf32, #tpu.memory_space<vmem>>, vector<8x1xf32>,
    } else {
    }
    %c8_i32_9 = arith.constant 8 : i32
    %18 = arith.addi %6, %c8_i32_9 : i32
    %19 = arith.cmpi slt, %7, %18 : i32
    %c16_i32_10 = arith.constant 16 : i32
    %20 = arith.addi %7, %c16_i32_10 : i32
    %21 = arith.cmpi slt, %6, %20 : i32
    %22 = arith.andi %19, %21 : i1
    %23 = arith.extui %22 : i1 to i32
    %c0_i32_11 = arith.constant 0 : i32
    %24 = arith.cmpi ne, %23, %c0_i32_11 : i32
    scf.if %24 {
      %31 = tpu.iota {dimensions = array<i32: 0>} : vector<8x16xi32>
      %32 = vector.broadcast %6 : i32 to vector<8x16xi32>
      %33 = arith.addi %32, %31 : vector<8x16xi32>
      %34 = tpu.iota {dimensions = array<i32: 1>} : vector<8x16xi32>
      %35 = vector.broadcast %7 : i32 to vector<8x16xi32>
      %36 = arith.addi %35, %34 : vector<8x16xi32>
      %37 = arith.cmpi eq, %33, %36 : vector<8x16xi32>
      %cst_15 = arith.constant 0xFF800000 : f32
      %38 = vector.broadcast %cst_15 : f32 to vector<8x16xf32>
      %39 = arith.select %37, %38, %5 : vector<8x16xi1>, vector<8x16xf32>
      %c0_16 = arith.constant 0 : index
      %c0_17 = arith.constant 0 : index
      %40 = vector.load %arg5[%c0_16, %c0_17] : memref<8x1xf32, #tpu.memory_space<vmem>>, vector<8x1xf32>
      %cst_18 = arith.constant dense<0xFF800000> : vector<8xf32>
      %41 = vector.multi_reduction <maximumf>, %39, %cst_18 [1] : vector<8x16xf32> to vector<8xf32>
      %42 = vector.shape_cast %41 : vector<8xf32> to vector<8x1xf32>
      %43 = arith.maximumf %40, %42 : vector<8x1xf32>
      %44 = arith.subf %40, %43 : vector<8x1xf32>
      %45 = math.exp %44 : vector<8x1xf32>
      %c0_19 = arith.constant 0 : index
      %c0_20 = arith.constant 0 : index
      %46 = vector.load %arg6[%c0_19, %c0_20] : memref<8x1xf32, #tpu.memory_space<vmem>>, vector<8x1xf32>
      %47 = arith.mulf %45, %46 : vector<8x1xf32>
      %48 = vector.broadcast %43 : vector<8x1xf32> to vector<8x16xf32>
      %49 = arith.subf %39, %48 : vector<8x16xf32>
      %50 = math.exp %49 : vector<8x16xf32>
      %cst_21 = arith.constant dense<0.000000e+00> : vector<8xf32>
      %51 = vector.multi_reduction <add>, %50, %cst_21 [1] : vector<8x16xf32> to vector<8xf32>
      %52 = vector.shape_cast %51 : vector<8xf32> to vector<8x1xf32>
      %53 = arith.addf %47, %52 : vector<8x1xf32>
      %c0_22 = arith.constant 0 : index
      %c0_23 = arith.constant 0 : index
      %54 = vector.load %arg6[%c0_22, %c0_23] : memref<8x1xf32, #tpu.memory_space<vmem>>, vector<8x1xf32>
      tpu.vector_store %arg6[%c0_22, %c0_23], %53 {strides = array<i32>} : memref<8x1xf32, #tpu.memory_space<vmem>>, vector<8x1xf32>,
      %c0_24 = arith.constant 0 : index
      %c0_25 = arith.constant 0 : index
      %55 = vector.load %arg5[%c0_24, %c0_25] : memref<8x1xf32, #tpu.memory_space<vmem>>, vector<8x1xf32>
      tpu.vector_store %arg5[%c0_24, %c0_25], %43 {strides = array<i32>} : memref<8x1xf32, #tpu.memory_space<vmem>>, vector<8x1xf32>,
    } else {
    }
    %true = arith.constant true
    %25 = arith.xori %22, %true : i1
    %26 = arith.extui %25 : i1 to i32
    %c0_i32_12 = arith.constant 0 : i32
    %27 = arith.cmpi ne, %26, %c0_i32_12 : i32
    scf.if %27 {
      %c0_15 = arith.constant 0 : index
      %c0_16 = arith.constant 0 : index
      %31 = vector.load %arg5[%c0_15, %c0_16] : memref<8x1xf32, #tpu.memory_space<vmem>>, vector<8x1xf32>
      %cst_17 = arith.constant dense<0xFF800000> : vector<8xf32>
      %32 = vector.multi_reduction <maximumf>, %5, %cst_17 [1] : vector<8x16xf32> to vector<8xf32>
      %33 = vector.shape_cast %32 : vector<8xf32> to vector<8x1xf32>
      %34 = arith.maximumf %31, %33 : vector<8x1xf32>
      %35 = arith.subf %31, %34 : vector<8x1xf32>
      %36 = math.exp %35 : vector<8x1xf32>
      %c0_18 = arith.constant 0 : index
      %c0_19 = arith.constant 0 : index
      %37 = vector.load %arg6[%c0_18, %c0_19] : memref<8x1xf32, #tpu.memory_space<vmem>>, vector<8x1xf32>
      %38 = arith.mulf %36, %37 : vector<8x1xf32>
      %39 = vector.broadcast %34 : vector<8x1xf32> to vector<8x16xf32>
      %40 = arith.subf %5, %39 : vector<8x16xf32>
      %41 = math.exp %40 : vector<8x16xf32>
      %cst_20 = arith.constant dense<0.000000e+00> : vector<8xf32>
      %42 = vector.multi_reduction <add>, %41, %cst_20 [1] : vector<8x16xf32> to vector<8xf32>
      %43 = vector.shape_cast %42 : vector<8xf32> to vector<8x1xf32>
      %44 = arith.addf %38, %43 : vector<8x1xf32>
      %c0_21 = arith.constant 0 : index
      %c0_22 = arith.constant 0 : index
      %45 = vector.load %arg6[%c0_21, %c0_22] : memref<8x1xf32, #tpu.memory_space<vmem>>, vector<8x1xf32>
      tpu.vector_store %arg6[%c0_21, %c0_22], %44 {strides = array<i32>} : memref<8x1xf32, #tpu.memory_space<vmem>>, vector<8x1xf32>,
      %c0_23 = arith.constant 0 : index
      %c0_24 = arith.constant 0 : index
      %46 = vector.load %arg5[%c0_23, %c0_24] : memref<8x1xf32, #tpu.memory_space<vmem>>, vector<8x1xf32>
      tpu.vector_store %arg5[%c0_23, %c0_24], %34 {strides = array<i32>} : memref<8x1xf32, #tpu.memory_space<vmem>>, vector<8x1xf32>,
    } else {
    }
    %c0_i32_13 = arith.constant 0 : i32
    %28 = arith.cmpi eq, %arg1, %c0_i32_13 : i32
    %29 = arith.extui %28 : i1 to i32
    %c0_i32_14 = arith.constant 0 : i32
    %30 = arith.cmpi ne, %29, %c0_i32_14 : i32
    scf.if %30 {
      %c0_15 = arith.constant 0 : index
      %c0_16 = arith.constant 0 : index
      %31 = vector.load %arg5[%c0_15, %c0_16] : memref<8x1xf32, #tpu.memory_space<vmem>>, vector<8x1xf32>
      %c0_17 = arith.constant 0 : index
      %c0_18 = arith.constant 0 : index
      %32 = vector.load %arg6[%c0_17, %c0_18] : memref<8x1xf32, #tpu.memory_space<vmem>>, vector<8x1xf32>
      %33 = math.log %32 : vector<8x1xf32>
      %34 = arith.addf %31, %33 : vector<8x1xf32>
      %c0_19 = arith.constant 0 : index
      %c0_20 = arith.constant 0 : index
      %35 = vector.load %arg7[%c0_19, %c0_20] : memref<8x1xf32, #tpu.memory_space<vmem>>, vector<8x1xf32>
      %36 = arith.subf %34, %35 : vector<8x1xf32>
      %c0_21 = arith.constant 0 : index
      %c0_22 = arith.constant 0 : index
      %37 = vector.load %arg4[%c0_21, %c0_22] : memref<8x1xf32, #tpu.memory_space<vmem>>, vector<8x1xf32>
      tpu.vector_store %arg4[%c0_21, %c0_22], %36 {strides = array<i32>} : memref<8x1xf32, #tpu.memory_space<vmem>>, vector<8x1xf32>,
    } else {
    }
    return
  }
  func.func @transform_0(%arg0: i32, %arg1: i32) -> (i32, i32) {
    %c0_i32 = arith.constant 0 : i32
    %c0_i32_0 = arith.constant 0 : i32
    return %arg0, %c0_i32 : i32, i32
  }
  func.func @transform_1(%arg0: i32, %arg1: i32) -> (i32, i32) {
    %c0_i32 = arith.constant 0 : i32
    %c0_i32_0 = arith.constant 0 : i32
    return %arg1, %c0_i32 : i32, i32
  }
  func.func @transform_2(%arg0: i32, %arg1: i32) -> (i32, i32) {
    %c0_i32 = arith.constant 0 : i32
    %c0_i32_0 = arith.constant 0 : i32
    return %arg0, %c0_i32 : i32, i32
  }
}

</mosaic_0001>

<bundles_post_ra>
// kernel: tpu_custom_call.1
= control target key start
LH: loop header
LB: loop body
LE: loop exit
PB: predicated region body
PF: predicated region fallthrough
CT: control target
= control target key end

     0   :  { %7 = vsyncpa [#allocation6], 0  ;;  %s860_s0 = inlined_call_operand.hbm [shape: bf16[16,128], index: 0, kind: input, shape index: {}]   ;;  %s861_s1 = inlined_call_operand.hbm [shape: bf16[16,128], index: 1, kind: input, shape index: {}]   ;;  %s862_s2 = inlined_call_operand.vmem [shape: f32[16,1], index: 2, kind: output, shape index: {}]  }
   0x1   :  { %9 = vsyncpa [#allocation6 + $0x1], 0 }
   0x2   :  { %10 = vsyncpa [#allocation8], 0  ;;  %s700_s9 = smov 0   ;;  %s702_s10 = smov 0  }
   0x3   :  { %s704_s11 = smov 0   ;;  %s706_s12 = smov 0  }
   0x4   :  { %s708_s13 = smov 0   ;;  %s710_s14 = smov 0  }
   0x5 LB: > { %s455_s15 = sadd.s32 4294967295, %s674_s14   ;;  %p48_p0 = scmp.ne.s32.totalorder %s658_s10, %s654_s9  ;;  %s674_s14 = sphi %s710_s14, %s16_s14   ;;  %s670_s13 = sphi %s708_s13, %s873_s13   ;;  %s666_s12 = sphi %s706_s12, %s872_s12   ;;  %s662_s11 = sphi %s704_s11, %s871_s11   ;;  %s658_s10 = sphi %s702_s10, %s870_s10   ;;  %s654_s9 = sphi %s700_s9, %s869_s9  }
   0x6   : > { %p730_p1 = scmp.eq.s32.totalorder %s455_s15, 0  ;;  %p457_p2 = scmp.ge.s32.totalorder %s674_s14, 1 }
   0x7   : > { %p111_p3 = scmp.lt.s32.totalorder %s674_s14, 3  ;;  %s676_s19 = smov [#allocation7]  }
   0x8   : > { %p738_p4 = por %p730_p1, %p48_p0  ;;  %s126_s20 = sshll.u32 %s676_s19, 4  ;;  %s127_s20 = int_to_ptr.vmem [resolvable:$true] %s126_s20 }
   0x9   : > { %p742_p5 = pnand %p457_p2, %p111_p3  ;;  %s28_s22 = sadd.s32 1, %s670_s13 }
   0xa   : > { %s577_s23 = scalar_lea.vmem %s127_s20, 128  ;;  %p585_p12 = scmp.lt.s32.totalorder %s127_s20, %s127_s20 }
   0xb   : > { %p486_p6 = pneg %p742_p5  ;;  %p578_p9 = scmp.ne.s32.totalorder %s127_s20, %s577_s23 }
   0xc   : > { %p586_p13 = scmp.lt.s32.totalorder %s577_s23, %s577_s23 }
   0xd   : > { %p750_p7 = pnand %p486_p6, %p730_p1 }
   0xe   : > { %p587_p0 = por %p586_p13, %p585_p12 }
   0xf   : > { %p568_p8 = pneg %p750_p7 }
  0x11   : > { %p580_p10 = pnand %p578_p9, %p568_p8 }
  0x13   : > { %p581_p11 = pneg %p580_p10 }
  0x15   : > { %p588_p2 = pnand %p587_p0, %p581_p11 }
  0x17   : > { %591 = shalt.err (!%p588_p2)
}
  0x18   : > { %s677_s24 = smov 64   ;;  %s678_s25 = smov 4  }
  0x19   : > { %489 = dma.hbm_to_vmem [thread:$0]  (!%p750_p7), %s861_s1, 128, %s127_s20, [#allocation8], %s677_s24, %s677_s24, %s678_s25  }
  0x1a   : > { %p30_p3 = scmp.ge.s32.totalorder %s28_s22, 2  ;;  %s35_s28 = sadd.s32 1, %s662_s11 }
  0x1b   : > { %p42_p6 = scmp.ne.s32.totalorder %s662_s11, %s658_s10  ;;  %p43_p8 = scmp.eq.s32.totalorder %s674_s14, 0 }
  0x1c   : > { %s875_s22 = smov (%p30_p3, %s28_s22), 0  ;;  %p495_p10 = scmp.lt.s32.totalorder %s674_s14, 2 }
  0x1d   : > { %p44_p9 = por %p43_p8, %p42_p6  ;;  %s32_s29 = ssub.s32 %s670_s13, %s875_s22 }
  0x1e   : > { %s140_s30 = sand.u32 1, %s662_s11   ;;  %p33_p11 = scmp.eq.s32.totalorder %s32_s29, 0 }
  0x1f   : > { %s460_s3 = sshll.u32 %s140_s30, 2  ;;  %s461_s4 = sshll.u32 %s670_s13, 6 }
  0x20   : > { %s774_s5 = scalar_select %p33_p11, %s662_s11, %s35_s28  }
  0x21   : > { %s149_s8 = scalar_lea.hbm %s860_s0, %s461_s4  ;;  %s144_s9 = scalar_lea.vmem [#allocation5], %s460_s3 }
  0x22   : > { %s151_s15 = sshll.u32 %s144_s9, 4  ;;  %p779_p7 = pnand %p495_p10, %p44_p9  ;;  %s152_s15 = int_to_ptr.vmem [resolvable:$true] %s151_s15 }
  0x23   : > { %s141_s20 = scalar_lea.sflag [#allocation6], %s140_s30  ;;  %s605_s21 = scalar_lea.vmem %s152_s15, 64 }
  0x24   : > { %p594_p12 = pneg %p779_p7  ;;  %p606_p13 = scmp.ne.s32.totalorder %s152_s15, %s605_s21 }
  0x25   : > { %s679_s23 = smov [#allocation5]  }
  0x26   : > { %p608_p0 = pnand %p606_p13, %p594_p12  ;;  %s610_s24 = sshll.u32 %s679_s23, 4  ;;  %s611_s24 = int_to_ptr.vmem [resolvable:$false] %s610_s24 }
  0x27   : > { %s612_s25 = scalar_lea.vmem %s611_s24, 128  ;;  %p613_p3 = scmp.lt.s32.totalorder %s152_s15, %s611_s24 }
  0x28   : > { %p609_p2 = pneg %p608_p0  ;;  %p614_p6 = scmp.lt.s32.totalorder %s612_s25, %s605_s21 }
  0x2a   : > { %p615_p8 = por %p614_p6, %p613_p3 }
  0x2c   : > { %p616_p9 = pnand %p615_p8, %p609_p2 }
  0x2e   : > { %619 = shalt.err (!%p616_p9)
}
  0x2f   : > { %493 = dma.hbm_to_vmem [thread:$0]  (!%p779_p7), %s149_s8, 64, %s152_s15, %s141_s20  }
  0x30   : > { %160 = sbr.rel (%p742_p5) target bundleno = 1313 (0x521), region = 28  ;;  %s162_s26 = sand.u32 (!%p742_p5), 1, %s658_s10  }
  0x31   : > { %s463_s27 = sshll.u32 (!%p742_p5), %s162_s26, 2  ;;  %s163_s28 = scalar_lea.sflag (!%p742_p5), [#allocation6], %s162_s26 }
  0x32   : > { %s166_s29 = scalar_lea.vmem (!%p742_p5), [#allocation5], %s463_s27 }
  0x35   : > { %645 = dma.done.wait (%p738_p4), %s163_s28, 64  }
  0x36   : > { %647 = vsyncadd (%p738_p4), %s163_s28, 4294967232 }
  0x37   : > { %649 = dma.done.wait (%p730_p1), [#allocation8], 128  }
  0x38   : > { %651 = vsyncadd (%p730_p1), [#allocation8], 4294967168  ;;  %vm200_vm0 = vcmask 7168   ;;  %p191_p5 = scmp.lt.s32.totalorder %s666_s12, 1  ;;  %v680_v0 = vmov -inf   ;;  %v681_v1 = vmov 0.0  }
  0x39   : > { %201 = vst.msk [vmem:[#allocation2] sm:$0xff] %vm200_vm0, %v680_v0  ;;  %202 = vst.msk [vmem:[#allocation3] sm:$0xff] %vm200_vm0, %v681_v1  ;;  %474 = vmatprep.subr.bf16.mxu0 %v681_v1  ;;  %vm682_vm1 = vmmov 0   ;;  %v553_v2 = vld [vmem:[#allocation7] sm:$0xff]   ;;  %v204_v3 = vld [vmem:[%s166_s29] sm:$0xf] }
  0x3a   : > { %203 = vst.msk [vmem:[#allocation4] sm:$0xff] %vm200_vm0, %v681_v1  ;;  %s192_s17 = scalar_select %p191_p5, %s666_s12, 1  ;;  %476 = vmatprep.mubr.msk.bf16.mxu0 %vm682_vm1, %v681_v1  ;;  %475 = vmatpush3.bf16.xpose.msra.mxu0 %v553_v2 }
  0x3b   : > { %s809_s4 = sshll.u32 %s666_s12, 3 }
  0x3c   : > { %s465_s18 = sshll.u32 %s192_s17, 3  ;;  %p255_p1 = scmp.lt.s32.totalorder %s809_s4, 8 }
  0x3d   : > { %s806_s3 = scalar_lea.vmem %s862_s2, %s465_s18 }
  0x3e   : > { %s256_s6 = scalar_select %p255_p1, 8, 4294967288 }
  0x40   : > { %s257_s7 = sadd.s32 %s809_s4, %s256_s6 }
  0x41   : > { %477 = vmatmul.mubr.bf16.vlgmr.msra.gmra.mxu0 %v204_v3  ;;  %s258_s8 = sadd.s32 8, %s257_s7  ;;  %p261_p10 = scmp.lt.s32.totalorder %s257_s7, 16 }
  0x42   : > { %p468_p4 = scmp.gt.s32.totalorder %s258_s8, 0 }
  0x44   : > { %p262_p11 = pnand %p468_p4, %p261_p10 }
 0x101   : > { %v813_v4 = vpop.f32.mrf.mxu0 }
 0x103   : > { %v478_v5 = vpop.f32.mrf.mxu0  ;;  %265 = sbr.rel (%p262_p11) target bundleno = 416 (0x1a0), region = 44 }
 0x105   : > { %v250_v6 = vpop.f32.mrf.mxu0 }
 0x107   : > { %v479_v7 = vpop.f32.mrf.mxu0 }
 0x108   : > { %v266_v8 = vlaneseq  ;;  %v268_v9 = vstv %s809_s4  ;;  %v274_v11 = vstv %s256_s6  ;;  %vm279_vm2 = vcmask 130048   ;;  %v277_v17 = vld [vmem:[#allocation4] sm:$0xff] }
 0x10a   : > { %v267_v10 = vshrl.u32 %v266_v8, 7  ;;  %v271_v13 = vand.u32 127, %v266_v8 }
 0x10c   : > { %v269_v12 = vadd.s32 %v268_v9, %v267_v10 }
 0x10e   : > { %v275_v14 = vadd.s32 %v274_v11, %v269_v12 }
 0x110   : > { %vm276_vm3 = vcmp.eq.s32.totalorder %v271_v13, %v275_v14 }
 0x111   : > { %v278_v15 = vsel %vm276_vm3, %v813_v4, 0.0 }
 0x112   : > { %v280_v16 = vsel %vm279_vm2, %v278_v15, 0.0 }
 0x113   : > { %281 = vadd.xlane.f32.xlu0 %v280_v16 }
 0x19c   : > { %v282_v18 = vpop.xlane.xlu0 %281 }
 0x19d   : > { %v283_v19 = vadd.f32 %v282_v18, %v277_v17 }
 0x19f   : > { %285 = vst.msk [vmem:[#allocation4] sm:$0xff] %vm200_vm0, %v283_v19 }
 0x1a0 PF: > { %s286_s12 = sadd.s32 8, %s809_s4  ;;  %p288_p7 = scmp.lt.s32.totalorder %s809_s4, 16 }
 0x1a1   : > { %p469_p12 = scmp.gt.s32.totalorder %s286_s12, 0 }
 0x1a3   : > { %p820_p13 = pnand %p469_p12, %p288_p7 }
 0x1a5   : > { %292 = sbr.rel (%p820_p13) target bundleno = 859 (0x35b), region = 48 }
 0x1aa   : > { %v293_v20 = vlaneseq  ;;  %v295_v21 = vstv %s809_s4  ;;  %vm304_vm4 = vcmask 130048   ;;  %v683_v27 = vmov 0   ;;  %v303_v28 = vld [vmem:[#allocation2] sm:$0xff]  ;;  %v312_v39 = vld [vmem:[#allocation3] sm:$0xff] }
 0x1ab   : > { %554 = vset.pattern.permute.xlu0 %v683_v27 }
 0x1ac   : > { %v294_v22 = vshrl.u32 %v293_v20, 7  ;;  %v298_v23 = vand.u32 127, %v293_v20 }
 0x1ae   : > { %v296_v24 = vadd.s32 %v295_v21, %v294_v22 }
 0x1b0   : > { %vm301_vm5 = vcmp.eq.s32.totalorder %v296_v24, %v298_v23 }
 0x1b1   : > { %v302_v25 = vsel %vm301_vm5, -inf, %v813_v4 }
 0x1b2   : > { %v305_v26 = vsel %vm304_vm4, %v302_v25, -inf }
 0x1b3   : > { %306 = vmax.xlane.f32.xlu0 %v305_v26 }
 0x23c   : > { %v307_v29 = vpop.xlane.xlu0 %306 }
 0x23d   : > { %v308_v30 = vmax.f32 %v303_v28, %v307_v29 }
 0x23f   : > { %v309_v31 = vsub.f32 %v303_v28, %v308_v30  ;;  %328 = vst.msk [vmem:[#allocation2] sm:$0xff] %vm200_vm0, %v308_v30  ;;  %316 = vperm.xlu0 %554, %v308_v30  }
 0x241   : > { %v310_v37 = vmul.f32 1.442695, %v309_v31 }
 0x2ba   : > { %v317_v32 = vpop.permute.xlu0 %316 }
 0x2bb   : > { %v319_v33 = vsub.f32 %v302_v25, %v317_v32 }
 0x2bd   : > { %v320_v34 = vmul.f32 1.442695, %v319_v33 }
 0x2bf   : > { %555 = vpow2.f32 %v320_v34 }
 0x2c0   : > { %557 = vpow2.f32 %v310_v37 }
 0x2cc   : > { %v556_v35 = vpop.eup %555 }
 0x2cd   : > { %v322_v36 = vsel %vm304_vm4, %v556_v35, 0.0  ;;  %v558_v38 = vpop.eup %557 }
 0x2ce   : > { %323 = vadd.xlane.f32.xlu1 %v322_v36  ;;  %v313_v40 = vmul.f32 %v558_v38, %v312_v39 }
 0x357   : > { %v324_v41 = vpop.xlane.xlu1 %323 }
 0x358   : > { %v325_v42 = vadd.f32 %v324_v41, %v313_v40 }
 0x35a   : > { %327 = vst.msk [vmem:[#allocation3] sm:$0xff] %vm200_vm0, %v325_v42 }
 0x35b PF: > { %331 = sbr.rel (!%p820_p13) target bundleno = 1285 (0x505), region = 52  ;;  %vm333_vm6 = vcmask (%p820_p13), 130048   ;;  %v684_v44 = vmov (%p820_p13), 0   ;;  %v332_v45 = vld [vmem:[#allocation2] sm:$0xff] (%p820_p13) }
 0x35c   : > { %v334_v43 = vsel (%p820_p13), %vm333_vm6, %v813_v4, -inf  ;;  %559 = vset.pattern.permute.xlu0 (%p820_p13), %v684_v44 }
 0x35d   : > { %335 = vmax.xlane.f32.xlu0 (%p820_p13), %v334_v43 }
 0x361   : > { %v341_v56 = vld [vmem:[#allocation3] sm:$0xff] }
 0x3e6   : > { %v336_v46 = vpop.xlane.xlu0 %335 }
 0x3e7   : > { %v337_v47 = vmax.f32 %v332_v45, %v336_v46 }
 0x3e9   : > { %v338_v48 = vsub.f32 %v332_v45, %v337_v47  ;;  %357 = vst.msk [vmem:[#allocation2] sm:$0xff] %vm200_vm0, %v337_v47  ;;  %345 = vperm.xlu0 %559, %v337_v47  }
 0x3eb   : > { %v339_v54 = vmul.f32 1.442695, %v338_v48 }
 0x464   : > { %v346_v49 = vpop.permute.xlu0 %345 }
 0x465   : > { %v348_v50 = vsub.f32 %v813_v4, %v346_v49 }
 0x467   : > { %v349_v51 = vmul.f32 1.442695, %v348_v50 }
 0x469   : > { %560 = vpow2.f32 %v349_v51 }
 0x46a   : > { %562 = vpow2.f32 %v339_v54 }
 0x476   : > { %v561_v52 = vpop.eup %560 }
 0x477   : > { %v351_v53 = vsel %vm333_vm6, %v561_v52, 0.0  ;;  %v563_v55 = vpop.eup %562 }
 0x478   : > { %352 = vadd.xlane.f32.xlu1 %v351_v53  ;;  %v342_v57 = vmul.f32 %v563_v55, %v341_v56 }
 0x501   : > { %v353_v58 = vpop.xlane.xlu1 %352 }
 0x502   : > { %v354_v59 = vadd.f32 %v353_v58, %v342_v57 }
 0x504   : > { %356 = vst.msk [vmem:[#allocation3] sm:$0xff] %vm200_vm0, %v354_v59 }
 0x505 PF: > { %v361_v62 = vld [vmem:[#allocation2] sm:$0xff]  ;;  %v366_v0 = vld [vmem:[#allocation4] sm:$0xff] }
 0x50b   : > { %v362_v60 = vld [vmem:[#allocation3] sm:$0xff] }
 0x50c   : > { %564 = vlog2.f32 %v362_v60 }
 0x519   : > { %v565_v61 = vpop.eup %564 }
 0x51a   : > { %v364_v63 = vmul.f32 0.6931472, %v565_v61 }
 0x51c   : > { %v365_v1 = vadd.f32 %v364_v63, %v361_v62 }
 0x51e   : > { %v367_v2 = vsub.f32 %v365_v1, %v366_v0 }
 0x520   : > { %369 = vst.msk [vmem:[%s806_s3] sm:$0xff] %vm200_vm0, %v367_v2 }
 0x521 PF: > { %s16_s14 = sadd.s32 1, %s674_s14   ;;  %s869_s9 = smov %s658_s10 }
 0x522   : > { %p13_p0 = scmp.ge.s32.totalorder %s16_s14, 4   ;;  %s870_s10 = smov %s662_s11 }
 0x523   : > { %s871_s11 = smov %s774_s5  ;;  %s872_s12 = smov %s670_s13 }
 0x524   : > { %s873_s13 = smov %s875_s22  ;;  %15 = sbr.rel (!%p13_p0) target bundleno = 5 (0x5), region = 93 }
 0x529   :  { %389 = vsyncpa [#allocation6], 1 }
 0x52a   :  { %391 = vsyncpa [#allocation6 + $0x1], 1 }
 0x52b   :  { %392 = vsyncpa [#allocation8], 1 }

</bundles_post_ra>
